<compile_context>
chip_gen: v7x
topology: tpu7x:2x2x1
jax: 0.10.0
libtpu: 0.0.40
codegen_flags: <defaults>
</compile_context>

<pallas_src>
import functools

import jax
import jax.numpy as jnp
from jax.experimental import pallas as pl
from jax.experimental.pallas import tpu as pltpu

Z = 32  # latent size (module default)


def _round_up(n, m):
    return ((n + m - 1) // m) * m


def encoder_kernel(x_ref,
                   w1_ref, b1_ref,
                   w2_ref, b2_ref,
                   w3_ref, b3_ref,
                   wo_ref, bo_ref,
                   out_ref):
    """One batch tile: 3 ReLU-MLP layers + fused f32 (identity|mean|logvar) head."""
    # Cast the activation tile in VMEM (free VPU work) to the weight dtype
    # (bf16 by default) -- never cast in the wrapper (extra HBM pass).
    x = x_ref[...].astype(w1_ref.dtype)

    h1 = jnp.dot(x, w1_ref[...], preferred_element_type=jnp.float32) + b1_ref[...]
    h1 = jnp.maximum(h1, 0.0)

    h2 = jnp.dot(h1.astype(w2_ref.dtype), w2_ref[...],
                 preferred_element_type=jnp.float32) + b2_ref[...]
    h2 = jnp.maximum(h2, 0.0)

    feat = jnp.dot(h2.astype(w3_ref.dtype), w3_ref[...],
                   preferred_element_type=jnp.float32) + b3_ref[...]
    feat = jnp.maximum(feat, 0.0)                      # f32 features

    # Fused head in f32: [feat | feat@Wm + bm | feat@Wl + bl | 0] in one MXU
    # pass and one unmasked lane-dense 128-wide store.  `feat` is NOT cast, so
    # the identity columns pass the features through exactly.
    out = jnp.dot(feat, wo_ref[...], preferred_element_type=jnp.float32) + bo_ref[...]
    out_ref[...] = out.astype(out_ref.dtype)


def init_params(key, z=Z, dtype=jnp.float32):
    """Synthetic params in PyTorch Linear layout: W (out, in), b (out,)."""
    sizes = [(256, 784), (128, 256), (z, 128), (z, z), (z, z)]
    keys = jax.random.split(key, 2 * len(sizes))
    params = []
    for i, (out_f, in_f) in enumerate(sizes):
        bound = 1.0 / jnp.sqrt(in_f)
        w = jax.random.uniform(keys[2 * i], (out_f, in_f), dtype, -bound, bound)
        b = jax.random.uniform(keys[2 * i + 1], (out_f,), dtype, -bound, bound)
        params.append((w, b))
    return params


def prepare_params(torch_params, weight_dtype=jnp.bfloat16):
    """One-time packing of PyTorch-layout params into the kernel layout.

    Weights pre-transposed to (in, out) and cast to `weight_dtype` (bf16 by
    default -> half the weight-DMA bytes).  Biases and the fused head stay f32
    so accumulation, the feature pass-through and mean/logvar are exact in f32.
    """
    (w1, b1), (w2, b2), (w3, b3), (wm, bm), (wl, bl) = torch_params
    z = w3.shape[0]
    out_width = max(128, _round_up(3 * z, 128))  # lane-dense output slab width

    # Fused head: W_out = [I_z | Wm^T | Wl^T | 0],  b_out = [0 | bm | bl | 0]
    w_out = jnp.zeros((z, out_width), jnp.float32)
    w_out = w_out.at[:, 0:z].set(jnp.eye(z, dtype=jnp.float32))
    w_out = w_out.at[:, z:2 * z].set(jnp.transpose(wm).astype(jnp.float32))
    w_out = w_out.at[:, 2 * z:3 * z].set(jnp.transpose(wl).astype(jnp.float32))
    b_out = jnp.zeros((1, out_width), jnp.float32)
    b_out = b_out.at[:, z:2 * z].set(bm.astype(jnp.float32))
    b_out = b_out.at[:, 2 * z:3 * z].set(bl.astype(jnp.float32))

    return {
        "w1": jnp.transpose(w1).astype(weight_dtype),
        "b1": b1.reshape(1, -1).astype(jnp.float32),
        "w2": jnp.transpose(w2).astype(weight_dtype),
        "b2": b2.reshape(1, -1).astype(jnp.float32),
        "w3": jnp.transpose(w3).astype(weight_dtype),
        "b3": b3.reshape(1, -1).astype(jnp.float32),
        "w_out": w_out,   # f32 on purpose: exact identity pass-through of features
        "b_out": b_out,   # f32
    }


@functools.partial(jax.jit, static_argnames=("tb",))
def encoder_forward(x_nchw, p, tb=1024):
    """x_nchw: [B, 1, 28, 28]. Returns (features, mean, logvar), each [B, z] f32."""
    B = x_nchw.shape[0]
    z = p["w_out"].shape[0]        # static Python ints (from shapes, not values)
    ow = p["w_out"].shape[1]
    h1w = p["w1"].shape[1]
    h2w = p["w2"].shape[1]

    x = x_nchw.reshape(B, -1)      # [B, 784], same as .view(B, -1); no dtype cast here
    D = x.shape[1]

    # Batch tile: multiple of 8; at least 2 grid steps whenever B > 8 so v7x's
    # two TensorCores both get work; capped at `tb` (amortizes ~0.35us/step).
    TB = min(tb, _round_up(pl.cdiv(B, 2), 8))
    grid = (pl.cdiv(B, TB),)       # partial last block OK: rows independent,
                                   # writeback masked to B rows by Pallas.

    def _const(i):
        return (0, 0)

    in_specs = [
        pl.BlockSpec((TB, D), lambda i: (i, 0)),                 # activations: tiled on batch
        pl.BlockSpec(p["w1"].shape, _const), pl.BlockSpec(p["b1"].shape, _const),
        pl.BlockSpec(p["w2"].shape, _const), pl.BlockSpec(p["b2"].shape, _const),
        pl.BlockSpec(p["w3"].shape, _const), pl.BlockSpec(p["b3"].shape, _const),
        pl.BlockSpec(p["w_out"].shape, _const), pl.BlockSpec(p["b_out"].shape, _const),
    ]
    out_spec = pl.BlockSpec((TB, ow), lambda i: (i, 0))

    param_bytes = sum(int(p[k].size) * p[k].dtype.itemsize
                      for k in ("w1", "b1", "w2", "b2", "w3", "b3", "w_out", "b_out"))
    cost = pl.CostEstimate(
        flops=int(2 * B * (D * h1w + h1w * h2w + h2w * z + z * ow)),
        transcendentals=0,
        bytes_accessed=int(int(x.size) * x.dtype.itemsize + param_bytes + B * ow * 4),
    )

    out = pl.pallas_call(
        encoder_kernel,
        out_shape=jax.ShapeDtypeStruct((B, ow), jnp.float32),
        grid=grid,
        in_specs=in_specs,
        out_specs=out_spec,
        compiler_params=pltpu.CompilerParams(
            dimension_semantics=("parallel",)),   # v7x: shard batch tiles across 2 TCs
        cost_estimate=cost,
    )(x, p["w1"], p["b1"], p["w2"], p["b2"], p["w3"], p["b3"],
      p["w_out"], p["b_out"])

    feat = out[:, 0:z]
    mean = out[:, z:2 * z]
    logvar = out[:, 2 * z:3 * z]
    return feat, mean, logvar


def encoder_forward_ref(x_nchw, torch_params):
    """Pure-JAX f32 reference (PyTorch-layout params) for verification."""
    x = x_nchw.reshape(x_nchw.shape[0], -1)
    (w1, b1), (w2, b2), (w3, b3), (wm, bm), (wl, bl) = torch_params
    h = jnp.maximum(x @ w1.T + b1, 0.0)
    h = jnp.maximum(h @ w2.T + b2, 0.0)
    feat = jnp.maximum(h @ w3.T + b3, 0.0)
    return feat, feat @ wm.T + bm, feat @ wl.T + bl


if __name__ == "__main__":
    key = jax.random.PRNGKey(0)
    k_x, k_p = jax.random.split(key)

    torch_params = init_params(k_p, z=Z)

    # --- f32 weights: tight-tolerance check (B divisible by tile) ---
    B = 8
    x = jax.random.normal(k_x, (B, 1, 28, 28), dtype=jnp.float32)  # NCHW, as in PyTorch
    p_f32 = prepare_params(torch_params, weight_dtype=jnp.float32)
    feat, mean, logvar = jax.block_until_ready(encoder_forward(x, p_f32))
    feat_r, mean_r, logvar_r = encoder_forward_ref(x, torch_params)
    assert feat.shape == (B, Z) and mean.shape == (B, Z) and logvar.shape == (B, Z)
    assert jnp.allclose(feat, feat_r, atol=1e-4, rtol=1e-4)
    assert jnp.allclose(mean, mean_r, atol=1e-4, rtol=1e-4)
    assert jnp.allclose(logvar, logvar_r, atol=1e-4, rtol=1e-4)

    # --- bf16 weights (default) + ragged batch: exercises the partial last block ---
    B2 = 13
    x2 = jax.random.normal(k_x, (B2, 1, 28, 28), dtype=jnp.float32)
    p_bf16 = prepare_params(torch_params)                # bf16 weights, f32 biases/head
    feat2, mean2, logvar2 = jax.block_until_ready(encoder_forward(x2, p_bf16))
    feat2_r, mean2_r, logvar2_r = encoder_forward_ref(x2, torch_params)
    assert feat2.shape == (B2, Z) and mean2.shape == (B2, Z) and logvar2.shape == (B2, Z)
    assert jnp.allclose(feat2, feat2_r, atol=5e-2, rtol=5e-2)
    assert jnp.allclose(mean2, mean2_r, atol=5e-2, rtol=5e-2)
    assert jnp.allclose(logvar2, logvar2_r, atol=5e-2, rtol=5e-2)

    print("KERNEL_OK")
</pallas_src>

<mosaic_0001>
module attributes {stable_mosaic.version = 11 : i64} {
  func.func @encoder_kernel(%arg0: i32, %arg1: memref<8x784xf32, #tpu.memory_space<vmem>>, %arg2: memref<784x256xf32, #tpu.memory_space<vmem>>, %arg3: memref<1x256xf32, #tpu.memory_space<vmem>>, %arg4: memref<256x128xf32, #tpu.memory_space<vmem>>, %arg5: memref<1x128xf32, #tpu.memory_space<vmem>>, %arg6: memref<128x32xf32, #tpu.memory_space<vmem>>, %arg7: memref<1x32xf32, #tpu.memory_space<vmem>>, %arg8: memref<32x128xf32, #tpu.memory_space<vmem>>, %arg9: memref<1x128xf32, #tpu.memory_space<vmem>>, %arg10: memref<8x128xf32, #tpu.memory_space<vmem>>) attributes {dimension_semantics = [#tpu.dimension_semantics<parallel>], iteration_bounds = array<i64: 1>, scalar_prefetch = 0 : i64, scratch_operands = 0 : i64, tpu.core_type = #tpu.core_type<tc>, window_params = [{transform_indices = @transform_0, window_bounds = array<i64: 8, 784>}, {pipeline_mode = #tpu.pipeline_mode<synchronous>, transform_indices = @transform_1, window_bounds = array<i64: 784, 256>}, {pipeline_mode = #tpu.pipeline_mode<synchronous>, transform_indices = @transform_2, window_bounds = array<i64: 1, 256>}, {pipeline_mode = #tpu.pipeline_mode<synchronous>, transform_indices = @transform_3, window_bounds = array<i64: 256, 128>}, {pipeline_mode = #tpu.pipeline_mode<synchronous>, transform_indices = @transform_4, window_bounds = array<i64: 1, 128>}, {pipeline_mode = #tpu.pipeline_mode<synchronous>, transform_indices = @transform_5, window_bounds = array<i64: 128, 32>}, {pipeline_mode = #tpu.pipeline_mode<synchronous>, transform_indices = @transform_6, window_bounds = array<i64: 1, 32>}, {pipeline_mode = #tpu.pipeline_mode<synchronous>, transform_indices = @transform_7, window_bounds = array<i64: 32, 128>}, {pipeline_mode = #tpu.pipeline_mode<synchronous>, transform_indices = @transform_8, window_bounds = array<i64: 1, 128>}, {transform_indices = @transform_9, window_bounds = array<i64: 8, 128>}]} {
    %c0 = arith.constant 0 : index
    %c0_0 = arith.constant 0 : index
    %0 = vector.load %arg1[%c0, %c0_0] : memref<8x784xf32, #tpu.memory_space<vmem>>, vector<8x784xf32>
    %c0_1 = arith.constant 0 : index
    %c0_2 = arith.constant 0 : index
    %1 = vector.load %arg2[%c0_1, %c0_2] : memref<784x256xf32, #tpu.memory_space<vmem>>, vector<784x256xf32>
    %cst = arith.constant dense<0.000000e+00> : vector<8x256xf32>
    %2 = tpu.matmul %0, %1, %cst {dimension_numbers = #tpu.dot_dimension_numbers<[1], [0], [0], [1], [0, 0, 1, 1], [], []>} : vector<8x784xf32>, vector<784x256xf32>, vector<8x256xf32> -> vector<8x256xf32>
    %c0_3 = arith.constant 0 : index
    %c0_4 = arith.constant 0 : index
    %3 = vector.load %arg3[%c0_3, %c0_4] : memref<1x256xf32, #tpu.memory_space<vmem>>, vector<1x256xf32>
    %4 = vector.broadcast %3 : vector<1x256xf32> to vector<8x256xf32>
    %5 = arith.addf %2, %4 : vector<8x256xf32>
    %cst_5 = arith.constant 0.000000e+00 : f32
    %6 = vector.broadcast %cst_5 : f32 to vector<8x256xf32>
    %7 = arith.maximumf %5, %6 : vector<8x256xf32>
    %c0_6 = arith.constant 0 : index
    %c0_7 = arith.constant 0 : index
    %8 = vector.load %arg4[%c0_6, %c0_7] : memref<256x128xf32, #tpu.memory_space<vmem>>, vector<256x128xf32>
    %cst_8 = arith.constant dense<0.000000e+00> : vector<8x128xf32>
    %9 = tpu.matmul %7, %8, %cst_8 {dimension_numbers = #tpu.dot_dimension_numbers<[1], [0], [0], [1], [0, 0, 1, 1], [], []>} : vector<8x256xf32>, vector<256x128xf32>, vector<8x128xf32> -> vector<8x128xf32>
    %c0_9 = arith.constant 0 : index
    %c0_10 = arith.constant 0 : index
    %10 = vector.load %arg5[%c0_9, %c0_10] : memref<1x128xf32, #tpu.memory_space<vmem>>, vector<1x128xf32>
    %11 = vector.broadcast %10 : vector<1x128xf32> to vector<8x128xf32>
    %12 = arith.addf %9, %11 : vector<8x128xf32>
    %cst_11 = arith.constant 0.000000e+00 : f32
    %13 = vector.broadcast %cst_11 : f32 to vector<8x128xf32>
    %14 = arith.maximumf %12, %13 : vector<8x128xf32>
    %c0_12 = arith.constant 0 : index
    %c0_13 = arith.constant 0 : index
    %15 = vector.load %arg6[%c0_12, %c0_13] : memref<128x32xf32, #tpu.memory_space<vmem>>, vector<128x32xf32>
    %cst_14 = arith.constant dense<0.000000e+00> : vector<8x32xf32>
    %16 = tpu.matmul %14, %15, %cst_14 {dimension_numbers = #tpu.dot_dimension_numbers<[1], [0], [0], [1], [0, 0, 1, 1], [], []>} : vector<8x128xf32>, vector<128x32xf32>, vector<8x32xf32> -> vector<8x32xf32>
    %c0_15 = arith.constant 0 : index
    %c0_16 = arith.constant 0 : index
    %17 = vector.load %arg7[%c0_15, %c0_16] : memref<1x32xf32, #tpu.memory_space<vmem>>, vector<1x32xf32>
    %18 = vector.broadcast %17 : vector<1x32xf32> to vector<8x32xf32>
    %19 = arith.addf %16, %18 : vector<8x32xf32>
    %cst_17 = arith.constant 0.000000e+00 : f32
    %20 = vector.broadcast %cst_17 : f32 to vector<8x32xf32>
    %21 = arith.maximumf %19, %20 : vector<8x32xf32>
    %c0_18 = arith.constant 0 : index
    %c0_19 = arith.constant 0 : index
    %22 = vector.load %arg8[%c0_18, %c0_19] : memref<32x128xf32, #tpu.memory_space<vmem>>, vector<32x128xf32>
    %cst_20 = arith.constant dense<0.000000e+00> : vector<8x128xf32>
    %23 = tpu.matmul %21, %22, %cst_20 {dimension_numbers = #tpu.dot_dimension_numbers<[1], [0], [0], [1], [0, 0, 1, 1], [], []>} : vector<8x32xf32>, vector<32x128xf32>, vector<8x128xf32> -> vector<8x128xf32>
    %c0_21 = arith.constant 0 : index
    %c0_22 = arith.constant 0 : index
    %24 = vector.load %arg9[%c0_21, %c0_22] : memref<1x128xf32, #tpu.memory_space<vmem>>, vector<1x128xf32>
    %25 = vector.broadcast %24 : vector<1x128xf32> to vector<8x128xf32>
    %26 = arith.addf %23, %25 : vector<8x128xf32>
    %c0_23 = arith.constant 0 : index
    %c0_24 = arith.constant 0 : index
    %27 = vector.load %arg10[%c0_23, %c0_24] : memref<8x128xf32, #tpu.memory_space<vmem>>, vector<8x128xf32>
    tpu.vector_store %arg10[%c0_23, %c0_24], %26 {strides = array<i32>} : memref<8x128xf32, #tpu.memory_space<vmem>>, vector<8x128xf32>,
    return
  }
  func.func @transform_0(%arg0: i32) -> (i32, i32) {
    %c0_i32 = arith.constant 0 : i32
    %c0_i32_0 = arith.constant 0 : i32
    return %arg0, %c0_i32 : i32, i32
  }
  func.func @transform_1(%arg0: i32) -> (i32, i32) {
    %c0_i32 = arith.constant 0 : i32
    %c0_i32_0 = arith.constant 0 : i32
    %c0_i32_1 = arith.constant 0 : i32
    return %c0_i32, %c0_i32_0 : i32, i32
  }
  func.func @transform_2(%arg0: i32) -> (i32, i32) {
    %c0_i32 = arith.constant 0 : i32
    %c0_i32_0 = arith.constant 0 : i32
    %c0_i32_1 = arith.constant 0 : i32
    return %c0_i32, %c0_i32_0 : i32, i32
  }
  func.func @transform_3(%arg0: i32) -> (i32, i32) {
    %c0_i32 = arith.constant 0 : i32
    %c0_i32_0 = arith.constant 0 : i32
    %c0_i32_1 = arith.constant 0 : i32
    return %c0_i32, %c0_i32_0 : i32, i32
  }
  func.func @transform_4(%arg0: i32) -> (i32, i32) {
    %c0_i32 = arith.constant 0 : i32
    %c0_i32_0 = arith.constant 0 : i32
    %c0_i32_1 = arith.constant 0 : i32
    return %c0_i32, %c0_i32_0 : i32, i32
  }
  func.func @transform_5(%arg0: i32) -> (i32, i32) {
    %c0_i32 = arith.constant 0 : i32
    %c0_i32_0 = arith.constant 0 : i32
    %c0_i32_1 = arith.constant 0 : i32
    return %c0_i32, %c0_i32_0 : i32, i32
  }
  func.func @transform_6(%arg0: i32) -> (i32, i32) {
    %c0_i32 = arith.constant 0 : i32
    %c0_i32_0 = arith.constant 0 : i32
    %c0_i32_1 = arith.constant 0 : i32
    return %c0_i32, %c0_i32_0 : i32, i32
  }
  func.func @transform_7(%arg0: i32) -> (i32, i32) {
    %c0_i32 = arith.constant 0 : i32
    %c0_i32_0 = arith.constant 0 : i32
    %c0_i32_1 = arith.constant 0 : i32
    return %c0_i32, %c0_i32_0 : i32, i32
  }
  func.func @transform_8(%arg0: i32) -> (i32, i32) {
    %c0_i32 = arith.constant 0 : i32
    %c0_i32_0 = arith.constant 0 : i32
    %c0_i32_1 = arith.constant 0 : i32
    return %c0_i32, %c0_i32_0 : i32, i32
  }
  func.func @transform_9(%arg0: i32) -> (i32, i32) {
    %c0_i32 = arith.constant 0 : i32
    %c0_i32_0 = arith.constant 0 : i32
    return %arg0, %c0_i32 : i32, i32
  }
}

</mosaic_0001>

<bundles_post_ra>
// kernel: encoder_forward.1
= control target key start
LH: loop header
LB: loop body
LE: loop exit
PB: predicated region body
PF: predicated region fallthrough
CT: control target
= control target key end

     0   :  { %14 = vsyncpa [#allocation3], 0  ;;  %s1250_s30 = smov [#allocation2]   ;;  %s1523_s0 = inlined_call_operand.vmem [shape: f32[8,784], index: 0, kind: input, shape index: {}]   ;;  %s1524_s1 = inlined_call_operand.hbm [shape: f32[784,256], index: 1, kind: input, shape index: {}]   ;;  %s1525_s2 = inlined_call_operand.vmem [shape: f32[1,256], index: 2, kind: input, shape index: {}]   ;;  %s1526_s3 = inlined_call_operand.vmem [shape: f32[256,128], index: 3, kind: input, shape index: {}]   ;;  %s1527_s4 = inlined_call_operand.vmem [shape: f32[1,128], index: 4, kind: input, shape index: {}]   ;;  %s1528_s5 = inlined_call_operand.vmem [shape: f32[128,32], index: 5, kind: input, shape index: {}]   ;;  %s1529_s6 = inlined_call_operand.vmem [shape: f32[1,32], index: 6, kind: input, shape index: {}]   ;;  %s1530_s7 = inlined_call_operand.vmem [shape: f32[32,128], index: 7, kind: input, shape index: {}]   ;;  %s1531_s8 = inlined_call_operand.vmem [shape: f32[1,128], index: 8, kind: input, shape index: {}]   ;;  %s1532_s9 = inlined_call_operand.vmem [shape: f32[8,128], index: 9, kind: output, shape index: {}]  }
   0x1   :  { %s22_s10 = sshll.u32 %s1250_s30, 4  ;;  %s1226_s13 = scalar_lea.hbm %s1524_s1, 25088  ;;  %s23_s10 = int_to_ptr.vmem [resolvable:$true] %s22_s10 }
   0x2   :  { %p1227_p0 = scmp.ne.s32.totalorder %s1524_s1, %s1226_s13  ;;  %p1230_p1 = scmp.lt.u32.totalorder %s1226_s13, %s1524_s1 }
   0x4   :  { %p1232_p2 = pnand %p1230_p1, %p1227_p0 }
   0x6   :  { %1235 = shalt.err (!%p1232_p2)
}
   0x7   :  { %s1236_s18 = scalar_lea.vmem %s23_s10, 25088  ;;  %p1241_p4 = scmp.lt.s32.totalorder %s23_s10, %s23_s10 }
   0x8   :  { %p1237_p3 = scmp.ne.s32.totalorder %s23_s10, %s1236_s18  ;;  %p1242_p5 = scmp.lt.s32.totalorder %s1236_s18, %s1236_s18 }
   0xa   :  { %p1243_p6 = por %p1242_p5, %p1241_p4 }
   0xc   :  { %p1244_p7 = pnand %p1243_p6, %p1237_p3 }
   0xe   :  { %1247 = shalt.err (!%p1244_p7)
}
   0xf   :  { %s1251_s19 = smov 256   ;;  %s1252_s20 = smov 16  }
  0x10   :  { %28 = dma.hbm_to_vmem [thread:$0]  %s1524_s1, 25088, %s23_s10, [#allocation3], %s1251_s19, %s1251_s19, %s1252_s20  }
  0x11   :  { %1248 = dma.done.wait [#allocation3], 25088  }
  0x12   :  { %1249 = vsyncadd [#allocation3], 4294942208  ;;  %v118_v0 = vld [vmem:[#allocation2 + $0x208] sm:$0xff]  ;;  %v120_v1 = vld [vmem:[#allocation2 + $0x218] sm:$0xff]  ;;  %vm261_vm0 = vcmask 130048   ;;  %vm1255_vm1 = vmmov 0  }
  0x13   :  { %v117_v2 = vld [vmem:[#allocation2 + $0x200] sm:$0xff]  ;;  %v1018_v3 = vpack.c.bf16 %v120_v1, %v118_v0  ;;  %v119_v4 = vld [vmem:[#allocation2 + $0x210] sm:$0xff]  ;;  %v122_v5 = vld [vmem:[#allocation2 + $0x228] sm:$0xff]  ;;  %vm766_vm2 = vcmask 261120  }
  0x14   :  { %v124_v6 = vld [vmem:[#allocation2 + $0x238] sm:$0xff]  ;;  %v1020_v7 = vpack.c.bf16 %v119_v4, %v117_v2  ;;  %v121_v9 = vld [vmem:[#allocation2 + $0x220] sm:$0xff]  ;;  %v123_v10 = vld [vmem:[#allocation2 + $0x230] sm:$0xff] }
  0x15   :  { %v1022_v8 = vpack.c.bf16 %v124_v6, %v122_v5  ;;  %v126_v11 = vld [vmem:[#allocation2 + $0x248] sm:$0xff]  ;;  %1019 = vmatprep.subr.bf16.mxu0 %v1018_v3  ;;  %v128_v12 = vld [vmem:[#allocation2 + $0x258] sm:$0xff]  ;;  %v1024_v13 = vpack.c.bf16 %v123_v10, %v121_v9  ;;  %v125_v15 = vld [vmem:[#allocation2 + $0x240] sm:$0xff] }
  0x16   :  { %1021 = vmatpush1.bf16.msra.mxu0 %v1020_v7  ;;  %v1026_v14 = vpack.c.bf16 %v128_v12, %v126_v11  ;;  %v127_v16 = vld [vmem:[#allocation2 + $0x250] sm:$0xff]  ;;  %v130_v17 = vld [vmem:[#allocation2 + $0x268] sm:$0xff]  ;;  %v132_v18 = vld [vmem:[#allocation2 + $0x278] sm:$0xff] }
  0x17   :  { %1023 = vmatprep.subr.bf16.mxu0 %v1022_v8  ;;  %v1028_v19 = vpack.c.bf16 %v127_v16, %v125_v15  ;;  %v1030_v20 = vpack.c.bf16 %v132_v18, %v130_v17  ;;  %v129_v21 = vld [vmem:[#allocation2 + $0x260] sm:$0xff]  ;;  %v131_v22 = vld [vmem:[#allocation2 + $0x270] sm:$0xff]  ;;  %v134_v23 = vld [vmem:[#allocation2 + $0x288] sm:$0xff] }
  0x18   :  { %v136_v24 = vld [vmem:[#allocation2 + $0x298] sm:$0xff]  ;;  %v1032_v25 = vpack.c.bf16 %v131_v22, %v129_v21  ;;  %v133_v27 = vld [vmem:[#allocation2 + $0x280] sm:$0xff]  ;;  %v135_v28 = vld [vmem:[#allocation2 + $0x290] sm:$0xff] }
  0x19   :  { %v1034_v26 = vpack.c.bf16 %v136_v24, %v134_v23  ;;  %v138_v29 = vld [vmem:[#allocation2 + $0x2a8] sm:$0xff]  ;;  %v140_v30 = vld [vmem:[#allocation2 + $0x2b8] sm:$0xff]  ;;  %v1036_v31 = vpack.c.bf16 %v135_v28, %v133_v27  ;;  %v137_v33 = vld [vmem:[#allocation2 + $0x2a0] sm:$0xff] }
  0x1a   :  { %1025 = vmatpush1.bf16.msra.mxu0 %v1024_v13  ;;  %v1038_v32 = vpack.c.bf16 %v140_v30, %v138_v29  ;;  %v139_v34 = vld [vmem:[#allocation2 + $0x2b0] sm:$0xff]  ;;  %v142_v35 = vld [vmem:[#allocation2 + $0x2c8] sm:$0xff]  ;;  %v144_v36 = vld [vmem:[#allocation2 + $0x2d8] sm:$0xff] }
  0x1b   :  { %1027 = vmatprep.subr.bf16.mxu0 %v1026_v14  ;;  %v1040_v37 = vpack.c.bf16 %v139_v34, %v137_v33  ;;  %v1042_v38 = vpack.c.bf16 %v144_v36, %v142_v35  ;;  %v141_v39 = vld [vmem:[#allocation2 + $0x2c0] sm:$0xff]  ;;  %v143_v40 = vld [vmem:[#allocation2 + $0x2d0] sm:$0xff]  ;;  %v49_v41 = vld [vmem:[%s1523_s0 + $0x18] sm:$0xff] }
  0x1c   :  { %v146_v42 = vld [vmem:[#allocation2 + $0x2e8] sm:$0xff]  ;;  %v148_v43 = vld [vmem:[#allocation2 + $0x2f8] sm:$0xff]  ;;  %400 = vmatprep.mubr.f32.mxu0 %v49_v41  ;;  %v1044_v44 = vpack.c.bf16 %v143_v40, %v141_v39  ;;  %v145_v45 = vld [vmem:[#allocation2 + $0x2e0] sm:$0xff] }
  0x1d   :  { %v147_v46 = vld [vmem:[#allocation2 + $0x2f0] sm:$0xff]  ;;  %v54_v47 = vld [vmem:[#allocation2 + $0x8] sm:$0xff]  ;;  %v1046_v48 = vpack.c.bf16 %v148_v43, %v146_v42  ;;  %v56_v49 = vld [vmem:[#allocation2 + $0x18] sm:$0xff] }
  0x1e   :  { %1029 = vmatpush1.bf16.msra.mxu0 %v1028_v19  ;;  %v53_v50 = vld [vmem:[#allocation2] sm:$0xff]  ;;  %v55_v51 = vld [vmem:[#allocation2 + $0x10] sm:$0xff]  ;;  %v150_v52 = vld [vmem:[#allocation2 + $0x308] sm:$0xff]  ;;  %v954_v54 = vpack.c.bf16 %v56_v49, %v54_v47  ;;  %v1048_v58 = vpack.c.bf16 %v147_v46, %v145_v45 }
  0x1f   :  { %1031 = vmatprep.subr.bf16.mxu0 %v1030_v20  ;;  %v152_v53 = vld [vmem:[#allocation2 + $0x318] sm:$0xff]  ;;  %v956_v55 = vpack.c.bf16 %v55_v51, %v53_v50  ;;  %v58_v56 = vld [vmem:[#allocation2 + $0x28] sm:$0xff]  ;;  %v149_v59 = vld [vmem:[#allocation2 + $0x300] sm:$0xff] }
  0x20   :  { %v60_v57 = vld [vmem:[#allocation2 + $0x38] sm:$0xff]  ;;  %955 = vmatprep.subr.bf16.mxu1 %v954_v54  ;;  %v57_v61 = vld [vmem:[#allocation2 + $0x20] sm:$0xff]  ;;  %v59_v62 = vld [vmem:[#allocation2 + $0x30] sm:$0xff]  ;;  %v1050_v63 = vpack.c.bf16 %v152_v53, %v150_v52 }
  0x21   :  { %v958_v60 = vpack.c.bf16 %v60_v57, %v58_v56  ;;  %v151_v0 = vld [vmem:[#allocation2 + $0x310] sm:$0xff]  ;;  %v154_v1 = vld [vmem:[#allocation2 + $0x328] sm:$0xff]  ;;  %v156_v2 = vld [vmem:[#allocation2 + $0x338] sm:$0xff]  ;;  %957 = vmatpush1.bf16.msra.mxu1 %v956_v55  ;;  %v960_v3 = vpack.c.bf16 %v59_v62, %v57_v61 }
  0x22   :  { %1033 = vmatpush1.bf16.msra.mxu0 %v1032_v25  ;;  %v62_v4 = vld [vmem:[#allocation2 + $0x48] sm:$0xff]  ;;  %v64_v5 = vld [vmem:[#allocation2 + $0x58] sm:$0xff]  ;;  %v61_v6 = vld [vmem:[#allocation2 + $0x40] sm:$0xff]  ;;  %v1052_v9 = vpack.c.bf16 %v151_v0, %v149_v59  ;;  %v1054_v12 = vpack.c.bf16 %v156_v2, %v154_v1 }
  0x23   :  { %1035 = vmatprep.subr.bf16.mxu0 %v1034_v26  ;;  %959 = vmatprep.subr.bf16.mxu1 %v958_v60  ;;  %v962_v7 = vpack.c.bf16 %v64_v5, %v62_v4  ;;  %v63_v8 = vld [vmem:[#allocation2 + $0x50] sm:$0xff]  ;;  %v153_v10 = vld [vmem:[#allocation2 + $0x320] sm:$0xff]  ;;  %v66_v11 = vld [vmem:[#allocation2 + $0x68] sm:$0xff] }
  0x24   :  { %v155_v13 = vld [vmem:[#allocation2 + $0x330] sm:$0xff]  ;;  %v158_v14 = vld [vmem:[#allocation2 + $0x348] sm:$0xff]  ;;  %v964_v15 = vpack.c.bf16 %v63_v8, %v61_v6  ;;  %v68_v16 = vld [vmem:[#allocation2 + $0x78] sm:$0xff] }
  0x25   :  { %961 = vmatpush1.bf16.msra.mxu1 %v960_v3  ;;  %v160_v17 = vld [vmem:[#allocation2 + $0x358] sm:$0xff]  ;;  %v966_v18 = vpack.c.bf16 %v68_v16, %v66_v11  ;;  %v65_v19 = vld [vmem:[#allocation2 + $0x60] sm:$0xff]  ;;  %v67_v20 = vld [vmem:[#allocation2 + $0x70] sm:$0xff]  ;;  %v1056_v23 = vpack.c.bf16 %v155_v13, %v153_v10 }
  0x26   :  { %1037 = vmatpush1.bf16.msra.mxu0 %v1036_v31  ;;  %963 = vmatprep.subr.bf16.mxu1 %v962_v7  ;;  %v70_v21 = vld [vmem:[#allocation2 + $0x88] sm:$0xff]  ;;  %v72_v22 = vld [vmem:[#allocation2 + $0x98] sm:$0xff]  ;;  %v1058_v24 = vpack.c.bf16 %v160_v17, %v158_v14  ;;  %v157_v25 = vld [vmem:[#allocation2 + $0x340] sm:$0xff]  ;;  %v968_v28 = vpack.c.bf16 %v67_v20, %v65_v19 }
  0x27   :  { %1039 = vmatprep.subr.bf16.mxu0 %v1038_v32  ;;  %v159_v26 = vld [vmem:[#allocation2 + $0x350] sm:$0xff]  ;;  %v162_v27 = vld [vmem:[#allocation2 + $0x368] sm:$0xff]  ;;  %v164_v29 = vld [vmem:[#allocation2 + $0x378] sm:$0xff]  ;;  %v970_v30 = vpack.c.bf16 %v72_v22, %v70_v21 }
  0x28   :  { %v69_v31 = vld [vmem:[#allocation2 + $0x80] sm:$0xff]  ;;  %v71_v32 = vld [vmem:[#allocation2 + $0x90] sm:$0xff]  ;;  %v74_v33 = vld [vmem:[#allocation2 + $0xa8] sm:$0xff]  ;;  %v1060_v35 = vpack.c.bf16 %v159_v26, %v157_v25  ;;  %v1062_v36 = vpack.c.bf16 %v164_v29, %v162_v27 }
  0x29   :  { %965 = vmatpush1.bf16.msra.mxu1 %v964_v15  ;;  %v76_v34 = vld [vmem:[#allocation2 + $0xb8] sm:$0xff]  ;;  %v166_v39 = vld [vmem:[#allocation2 + $0x388] sm:$0xff]  ;;  %v972_v40 = vpack.c.bf16 %v71_v32, %v69_v31  ;;  %v73_v43 = vld [vmem:[#allocation2 + $0xa0] sm:$0xff] }
  0x2a   :  { %1041 = vmatpush1.bf16.msra.mxu0 %v1040_v37  ;;  %967 = vmatprep.subr.bf16.mxu1 %v966_v18  ;;  %v161_v37 = vld [vmem:[#allocation2 + $0x360] sm:$0xff]  ;;  %v168_v41 = vld [vmem:[#allocation2 + $0x398] sm:$0xff]  ;;  %v974_v42 = vpack.c.bf16 %v76_v34, %v74_v33  ;;  %v78_v45 = vld [vmem:[#allocation2 + $0xc8] sm:$0xff] }
  0x2b   :  { %1043 = vmatprep.subr.bf16.mxu0 %v1042_v38  ;;  %v163_v38 = vld [vmem:[#allocation2 + $0x370] sm:$0xff]  ;;  %v80_v46 = vld [vmem:[#allocation2 + $0xd8] sm:$0xff]  ;;  %v165_v49 = vld [vmem:[#allocation2 + $0x380] sm:$0xff] }
  0x2c   :  { %v1064_v47 = vpack.c.bf16 %v163_v38, %v161_v37  ;;  %v167_v50 = vld [vmem:[#allocation2 + $0x390] sm:$0xff]  ;;  %v170_v51 = vld [vmem:[#allocation2 + $0x3a8] sm:$0xff]  ;;  %v172_v53 = vld [vmem:[#allocation2 + $0x3b8] sm:$0xff]  ;;  %v978_v54 = vpack.c.bf16 %v80_v46, %v78_v45 }
  0x2d   :  { %969 = vmatpush1.bf16.msra.mxu1 %v968_v28  ;;  %v77_v55 = vld [vmem:[#allocation2 + $0xc0] sm:$0xff]  ;;  %v79_v56 = vld [vmem:[#allocation2 + $0xd0] sm:$0xff]  ;;  %v82_v57 = vld [vmem:[#allocation2 + $0xe8] sm:$0xff]  ;;  %v1068_v59 = vpack.c.bf16 %v167_v50, %v165_v49  ;;  %v1070_v60 = vpack.c.bf16 %v172_v53, %v170_v51 }
  0x2e   :  { %1045 = vmatpush1.bf16.msra.mxu0 %v1044_v44  ;;  %971 = vmatprep.subr.bf16.mxu1 %v970_v30  ;;  %v75_v44 = vld [vmem:[#allocation2 + $0xb0] sm:$0xff]  ;;  %v169_v61 = vld [vmem:[#allocation2 + $0x3a0] sm:$0xff]  ;;  %v980_v0 = vpack.c.bf16 %v79_v56, %v77_v55  ;;  %v176_v1 = vld [vmem:[#allocation2 + $0x3d8] sm:$0xff] }
  0x2f   :  { %1047 = vmatprep.subr.bf16.mxu0 %v1046_v48  ;;  %v1066_v48 = vpack.c.bf16 %v168_v41, %v166_v39  ;;  %v976_v52 = vpack.c.bf16 %v75_v44, %v73_v43  ;;  %v171_v62 = vld [vmem:[#allocation2 + $0x3b0] sm:$0xff]  ;;  %v81_v3 = vld [vmem:[#allocation2 + $0xe0] sm:$0xff]  ;;  %v86_v5 = vld [vmem:[#allocation2 + $0x108] sm:$0xff] }
  0x30   :  { %v83_v4 = vld [vmem:[#allocation2 + $0xf0] sm:$0xff]  ;;  %v88_v6 = vld [vmem:[#allocation2 + $0x118] sm:$0xff]  ;;  %v1072_v7 = vpack.c.bf16 %v171_v62, %v169_v61  ;;  %v178_v11 = vld [vmem:[#allocation2 + $0x3e8] sm:$0xff] }
  0x31   :  { %973 = vmatpush1.bf16.msra.mxu1 %v972_v40  ;;  %v175_v10 = vld [vmem:[#allocation2 + $0x3d0] sm:$0xff]  ;;  %v180_v13 = vld [vmem:[#allocation2 + $0x3f8] sm:$0xff]  ;;  %v986_v14 = vpack.c.bf16 %v88_v6, %v86_v5  ;;  %v85_v15 = vld [vmem:[#allocation2 + $0x100] sm:$0xff] }
  0x32   :  { %1049 = vmatpush1.bf16.msra.mxu0 %v1048_v58  ;;  %975 = vmatprep.subr.bf16.mxu1 %v974_v42  ;;  %v84_v58 = vld [vmem:[#allocation2 + $0xf8] sm:$0xff]  ;;  %v87_v16 = vld [vmem:[#allocation2 + $0x110] sm:$0xff]  ;;  %v90_v17 = vld [vmem:[#allocation2 + $0x128] sm:$0xff]  ;;  %v1078_v20 = vpack.c.bf16 %v180_v13, %v178_v11 }
  0x33   :  { %1051 = vmatprep.subr.bf16.mxu0 %v1050_v63  ;;  %v174_v63 = vld [vmem:[#allocation2 + $0x3c8] sm:$0xff]  ;;  %v982_v2 = vpack.c.bf16 %v84_v58, %v82_v57  ;;  %v92_v18 = vld [vmem:[#allocation2 + $0x138] sm:$0xff]  ;;  %v177_v21 = vld [vmem:[#allocation2 + $0x3e0] sm:$0xff] }
  0x34   :  { %v1074_v8 = vpack.c.bf16 %v176_v1, %v174_v63  ;;  %v179_v22 = vld [vmem:[#allocation2 + $0x3f0] sm:$0xff]  ;;  %v184_v25 = vld [vmem:[#allocation2 + $0x418] sm:$0xff]  ;;  %v990_v26 = vpack.c.bf16 %v92_v18, %v90_v17  ;;  %v89_v27 = vld [vmem:[#allocation2 + $0x120] sm:$0xff] }
  0x35   :  { %977 = vmatpush1.bf16.msra.mxu1 %v976_v52  ;;  %v91_v28 = vld [vmem:[#allocation2 + $0x130] sm:$0xff]  ;;  %v94_v29 = vld [vmem:[#allocation2 + $0x148] sm:$0xff]  ;;  %v96_v30 = vld [vmem:[#allocation2 + $0x158] sm:$0xff]  ;;  %v1080_v31 = vpack.c.bf16 %v179_v22, %v177_v21 }
  0x36   :  { %1053 = vmatpush1.bf16.msra.mxu0 %v1052_v9  ;;  %979 = vmatprep.subr.bf16.mxu1 %v978_v54  ;;  %v173_v9 = vld [vmem:[#allocation2 + $0x3c0] sm:$0xff]  ;;  %v183_v34 = vld [vmem:[#allocation2 + $0x410] sm:$0xff]  ;;  %v188_v37 = vld [vmem:[#allocation2 + $0x438] sm:$0xff]  ;;  %v994_v38 = vpack.c.bf16 %v96_v30, %v94_v29 }
  0x37   :  { %1055 = vmatprep.subr.bf16.mxu0 %v1054_v12  ;;  %v984_v12 = vpack.c.bf16 %v83_v4, %v81_v3  ;;  %v1076_v19 = vpack.c.bf16 %v175_v10, %v173_v9  ;;  %v181_v33 = vld [vmem:[#allocation2 + $0x400] sm:$0xff]  ;;  %v95_v40 = vld [vmem:[#allocation2 + $0x150] sm:$0xff]  ;;  %v98_v41 = vld [vmem:[#allocation2 + $0x168] sm:$0xff] }
  0x38   :  { %v93_v39 = vld [vmem:[#allocation2 + $0x140] sm:$0xff]  ;;  %v100_v42 = vld [vmem:[#allocation2 + $0x178] sm:$0xff]  ;;  %v48_v43 = vld [vmem:[%s1523_s0 + $0x10] sm:$0xff]  ;;  %v1084_v44 = vpack.c.bf16 %v183_v34, %v181_v33 }
  0x39   :  { %981 = vmatpush1.bf16.msra.mxu1 %v980_v0  ;;  %v185_v45 = vld [vmem:[#allocation2 + $0x420] sm:$0xff]  ;;  %v187_v46 = vld [vmem:[#allocation2 + $0x430] sm:$0xff]  ;;  %v192_v49 = vld [vmem:[#allocation2 + $0x458] sm:$0xff]  ;;  %v996_v50 = vpack.c.bf16 %v95_v40, %v93_v39  ;;  %v998_v52 = vpack.c.bf16 %v100_v42, %v98_v41 }
  0x3a   :  { %1057 = vmatpush1.bf16.msra.mxu0 %v1056_v23  ;;  %983 = vmatprep.subr.bf16.mxu1 %v982_v2  ;;  %v182_v23 = vld [vmem:[#allocation2 + $0x408] sm:$0xff]  ;;  %v97_v53 = vld [vmem:[#allocation2 + $0x160] sm:$0xff]  ;;  %v99_v54 = vld [vmem:[#allocation2 + $0x170] sm:$0xff]  ;;  %v1088_v58 = vpack.c.bf16 %v187_v46, %v185_v45 }
  0x3b   :  { %1059 = vmatprep.subr.bf16.mxu0 %v1058_v24  ;;  %v988_v24 = vpack.c.bf16 %v87_v16, %v85_v15  ;;  %v1082_v32 = vpack.c.bf16 %v184_v25, %v182_v23  ;;  %v51_v51 = vld [vmem:[%s1523_s0 + $0x28] sm:$0xff]  ;;  %v104_v57 = vld [vmem:[#allocation2 + $0x198] sm:$0xff]  ;;  %v191_v61 = vld [vmem:[#allocation2 + $0x450] sm:$0xff]  ;;  %v1000_v63 = vpack.c.bf16 %v99_v54, %v97_v53 }
  0x3c   :  { %v47_v55 = vld [vmem:[%s1523_s0 + $0x8] sm:$0xff]  ;;  %v196_v0 = vld [vmem:[#allocation2 + $0x478] sm:$0xff]  ;;  %v101_v2 = vld [vmem:[#allocation2 + $0x180] sm:$0xff] }
  0x3d   :  { %985 = vmatpush1.bf16.msra.mxu1 %v984_v12  ;;  %v102_v56 = vld [vmem:[#allocation2 + $0x188] sm:$0xff]  ;;  %329 = vmatprep.mubr.f32.mxu1 %v47_v55  ;;  %v103_v3 = vld [vmem:[#allocation2 + $0x190] sm:$0xff]  ;;  %v108_v5 = vld [vmem:[#allocation2 + $0x1b8] sm:$0xff] }
  0x3e   :  { %1061 = vmatpush1.bf16.msra.mxu0 %v1060_v35  ;;  %987 = vmatprep.subr.bf16.mxu1 %v986_v14  ;;  %v186_v35 = vld [vmem:[#allocation2 + $0x428] sm:$0xff]  ;;  %v1002_v1 = vpack.c.bf16 %v104_v57, %v102_v56  ;;  %v195_v9 = vld [vmem:[#allocation2 + $0x470] sm:$0xff]  ;;  %v1004_v11 = vpack.c.bf16 %v103_v3, %v101_v2  ;;  %v200_v12 = vld [vmem:[#allocation2 + $0x498] sm:$0xff] }
  0x3f   :  { %1063 = vmatprep.subr.bf16.mxu0 %v1062_v36  ;;  %v992_v36 = vpack.c.bf16 %v91_v28, %v89_v27  ;;  %v194_v62 = vld [vmem:[#allocation2 + $0x468] sm:$0xff]  ;;  %v105_v14 = vld [vmem:[#allocation2 + $0x1a0] sm:$0xff]  ;;  %v107_v15 = vld [vmem:[#allocation2 + $0x1b0] sm:$0xff] }
  0x40   :  { %v106_v4 = vld [vmem:[#allocation2 + $0x1a8] sm:$0xff]  ;;  %v112_v17 = vld [vmem:[#allocation2 + $0x1d8] sm:$0xff]  ;;  %v199_v21 = vld [vmem:[#allocation2 + $0x490] sm:$0xff]  ;;  %v1008_v23 = vpack.c.bf16 %v107_v15, %v105_v14 }
  0x41   :  { %989 = vmatpush1.bf16.msra.mxu1 %v988_v24  ;;  %v198_v10 = vld [vmem:[#allocation2 + $0x488] sm:$0xff]  ;;  %v1006_v13 = vpack.c.bf16 %v108_v5, %v106_v4  ;;  %v204_v24 = vld [vmem:[#allocation2 + $0x4b8] sm:$0xff]  ;;  %v111_v27 = vld [vmem:[#allocation2 + $0x1d0] sm:$0xff] }
  0x42   :  { %1065 = vmatpush1.bf16.msra.mxu0 %v1064_v47  ;;  %991 = vmatprep.subr.bf16.mxu1 %v990_v26  ;;  %v1086_v47 = vpack.c.bf16 %v188_v37, %v186_v35  ;;  %v110_v16 = vld [vmem:[#allocation2 + $0x1c8] sm:$0xff]  ;;  %v109_v26 = vld [vmem:[#allocation2 + $0x1c0] sm:$0xff]  ;;  %v116_v29 = vld [vmem:[#allocation2 + $0x1f8] sm:$0xff] }
  0x43   :  { %1067 = vmatprep.subr.bf16.mxu0 %v1066_v48  ;;  %v190_v48 = vld [vmem:[#allocation2 + $0x448] sm:$0xff]  ;;  %v1010_v25 = vpack.c.bf16 %v112_v17, %v110_v16  ;;  %v203_v33 = vld [vmem:[#allocation2 + $0x4b0] sm:$0xff]  ;;  %v1012_v35 = vpack.c.bf16 %v111_v27, %v109_v26  ;;  %v567_v40 = vld [vmem:[%s1526_s3 + $0x80] sm:$0xff] }
  0x44   :  { %v202_v22 = vld [vmem:[#allocation2 + $0x4a8] sm:$0xff]  ;;  %v115_v39 = vld [vmem:[#allocation2 + $0x1f0] sm:$0xff]  ;;  %v570_v53 = vld [vmem:[%s1526_s3 + $0x98] sm:$0xff] }
  0x45   :  { %993 = vmatpush1.bf16.msra.mxu1 %v992_v36  ;;  %v114_v28 = vld [vmem:[#allocation2 + $0x1e8] sm:$0xff]  ;;  %v208_v36 = vld [vmem:[#allocation2 + $0x4d8] sm:$0xff]  ;;  %v207_v45 = vld [vmem:[#allocation2 + $0x4d0] sm:$0xff] }
  0x46   :  { %1069 = vmatpush1.bf16.msra.mxu0 %v1068_v59  ;;  %995 = vmatprep.subr.bf16.mxu1 %v994_v38  ;;  %v1090_v59 = vpack.c.bf16 %v192_v49, %v190_v48  ;;  %v206_v34 = vld [vmem:[#allocation2 + $0x4c8] sm:$0xff]  ;;  %v1014_v37 = vpack.c.bf16 %v116_v29, %v114_v28  ;;  %v113_v38 = vld [vmem:[#allocation2 + $0x1e0] sm:$0xff]  ;;  %v212_v48 = vld [vmem:[#allocation2 + $0x4f8] sm:$0xff] }
  0x47   :  { %1071 = vmatprep.subr.bf16.mxu0 %v1070_v60  ;;  %v189_v60 = vld [vmem:[#allocation2 + $0x440] sm:$0xff]  ;;  %v568_v41 = vld [vmem:[%s1526_s3 + $0x88] sm:$0xff]  ;;  %v211_v57 = vld [vmem:[#allocation2 + $0x4f0] sm:$0xff] }
  0x48   :  { %v1092_v6 = vpack.c.bf16 %v191_v61, %v189_v60  ;;  %v210_v46 = vld [vmem:[#allocation2 + $0x4e8] sm:$0xff]  ;;  %v1150_v49 = vpack.c.bf16 %v568_v41, %v567_v40  ;;  %v209_v55 = vld [vmem:[#allocation2 + $0x4e0] sm:$0xff]  ;;  %v216_v61 = vld [vmem:[#allocation2 + $0x518] sm:$0xff] }
  0x49   :  { %997 = vmatpush1.bf16.msra.mxu1 %v996_v50  ;;  %v551_v50 = vld [vmem:[%s1526_s3] sm:$0xff]  ;;  %v1110_v56 = vpack.c.bf16 %v212_v48, %v210_v46  ;;  %v572_v2 = vld [vmem:[%s1526_s3 + $0xa8] sm:$0xff]  ;;  %v1112_v3 = vpack.c.bf16 %v211_v57, %v209_v55  ;;  %v574_v14 = vld [vmem:[%s1526_s3 + $0xb8] sm:$0xff] }
  0x4a   :  { %1073 = vmatpush1.bf16.msra.mxu0 %v1072_v7  ;;  %999 = vmatprep.subr.bf16.mxu1 %v998_v52  ;;  %v1094_v7 = vpack.c.bf16 %v196_v0, %v194_v62  ;;  %v569_v52 = vld [vmem:[%s1526_s3 + $0x90] sm:$0xff]  ;;  %v554_v0 = vld [vmem:[%s1526_s3 + $0x18] sm:$0xff]  ;;  %v213_v5 = vld [vmem:[#allocation2 + $0x500] sm:$0xff] }
  0x4b   :  { %1075 = vmatprep.subr.bf16.mxu0 %v1074_v8  ;;  %v193_v8 = vld [vmem:[#allocation2 + $0x460] sm:$0xff]  ;;  %v1154_v62 = vpack.c.bf16 %v570_v53, %v569_v52  ;;  %v576_v26 = vld [vmem:[%s1526_s3 + $0xc8] sm:$0xff]  ;;  %v562_v48 = vld [vmem:[%s1526_s3 + $0x58] sm:$0xff] }
  0x4c   :  { %v1096_v18 = vpack.c.bf16 %v195_v9, %v193_v8  ;;  %v220_v9 = vld [vmem:[#allocation2 + $0x538] sm:$0xff]  ;;  %v217_v17 = vld [vmem:[#allocation2 + $0x520] sm:$0xff]  ;;  %v231_v52 = vld [vmem:[#allocation2 + $0x590] sm:$0xff] }
  0x4d   :  { %1001 = vmatpush1.bf16.msra.mxu1 %v1000_v63  ;;  %v553_v63 = vld [vmem:[%s1526_s3 + $0x10] sm:$0xff]  ;;  %v221_v29 = vld [vmem:[#allocation2 + $0x540] sm:$0xff]  ;;  %v236_v55 = vld [vmem:[#allocation2 + $0x5b8] sm:$0xff] }
  0x4e   :  { %1077 = vmatpush1.bf16.msra.mxu0 %v1076_v19  ;;  %1003 = vmatprep.subr.bf16.mxu1 %v1002_v1  ;;  %v1098_v19 = vpack.c.bf16 %v200_v12, %v198_v10  ;;  %v571_v1 = vld [vmem:[%s1526_s3 + $0xa0] sm:$0xff]  ;;  %v1156_v8 = vpack.c.bf16 %v554_v0, %v553_v63  ;;  %v556_v12 = vld [vmem:[%s1526_s3 + $0x28] sm:$0xff] }
  0x4f   :  { %1079 = vmatprep.subr.bf16.mxu0 %v1078_v20  ;;  %v197_v20 = vld [vmem:[#allocation2 + $0x480] sm:$0xff]  ;;  %v1158_v10 = vpack.c.bf16 %v572_v2, %v571_v1  ;;  %v239_v1 = vld [vmem:[#allocation2 + $0x5d0] sm:$0xff]  ;;  %v242_v2 = vld [vmem:[#allocation2 + $0x5e8] sm:$0xff] }
  0x50   :  { %v1100_v30 = vpack.c.bf16 %v199_v21, %v197_v20  ;;  %v224_v21 = vld [vmem:[#allocation2 + $0x558] sm:$0xff]  ;;  %v225_v41 = vld [vmem:[#allocation2 + $0x560] sm:$0xff] }
  0x51   :  { %1005 = vmatpush1.bf16.msra.mxu1 %v1004_v11  ;;  %v555_v11 = vld [vmem:[%s1526_s3 + $0x20] sm:$0xff] }
  0x52   :  { %1081 = vmatpush1.bf16.msra.mxu0 %v1080_v31  ;;  %1007 = vmatprep.subr.bf16.mxu1 %v1006_v13  ;;  %v1102_v31 = vpack.c.bf16 %v204_v24, %v202_v22  ;;  %v573_v13 = vld [vmem:[%s1526_s3 + $0xb0] sm:$0xff]  ;;  %v1160_v20 = vpack.c.bf16 %v556_v12, %v555_v11  ;;  %v558_v24 = vld [vmem:[%s1526_s3 + $0x38] sm:$0xff]  ;;  %v237_v0 = vld [vmem:[#allocation2 + $0x5c0] sm:$0xff] }
  0x53   :  { %1083 = vmatprep.subr.bf16.mxu0 %v1082_v32  ;;  %v201_v32 = vld [vmem:[#allocation2 + $0x4a0] sm:$0xff]  ;;  %v1162_v22 = vpack.c.bf16 %v574_v14, %v573_v13  ;;  %v247_v13 = vld [vmem:[#allocation2 + $0x610] sm:$0xff] }
  0x54   :  { %v1104_v42 = vpack.c.bf16 %v203_v33, %v201_v32  ;;  %v228_v33 = vld [vmem:[#allocation2 + $0x578] sm:$0xff]  ;;  %v245_v12 = vld [vmem:[#allocation2 + $0x600] sm:$0xff] }
  0x55   :  { %401 = vmatmul.mubr.f32.vlgmr.msra.gmra.mrb[0].mxu0 %v48_v43  ;;  %1009 = vmatpush1.bf16.msra.mxu1 %v1008_v23  ;;  %v1106_v43 = vpack.c.bf16 %v208_v36, %v206_v34  ;;  %v557_v23 = vld [vmem:[%s1526_s3 + $0x30] sm:$0xff]  ;;  %v560_v36 = vld [vmem:[%s1526_s3 + $0x48] sm:$0xff]  ;;  %v50_v14 = vld [vmem:[%s1523_s0 + $0x20] sm:$0xff] }
  0x56   :  { %1085 = vmatpush1.bf16.msra.mxu0 %v1084_v44  ;;  %471 = vmatprep.mubr.f32.mxu0 %v51_v51  ;;  %v205_v44 = vld [vmem:[#allocation2 + $0x4c0] sm:$0xff]  ;;  %v552_v51 = vld [vmem:[%s1526_s3 + $0x8] sm:$0xff]  ;;  %v1164_v32 = vpack.c.bf16 %v558_v24, %v557_v23  ;;  %v581_v24 = vld [vmem:[%s1526_s3 + $0xf0] sm:$0xff] }
  0x57   :  { %1087 = vmatprep.subr.bf16.mxu0 %v1086_v47  ;;  %1011 = vmatprep.subr.bf16.mxu1 %v1010_v25  ;;  %v1016_v47 = vpack.c.bf16 %v115_v39, %v113_v38  ;;  %v1108_v54 = vpack.c.bf16 %v207_v45, %v205_v44  ;;  %v1152_v60 = vpack.c.bf16 %v552_v51, %v551_v50  ;;  %v575_v25 = vld [vmem:[%s1526_s3 + $0xc0] sm:$0xff]  ;;  %v578_v38 = vld [vmem:[%s1526_s3 + $0xd8] sm:$0xff] }
  0x58   :  { %v1166_v34 = vpack.c.bf16 %v576_v26, %v575_v25  ;;  %v232_v45 = vld [vmem:[#allocation2 + $0x598] sm:$0xff]  ;;  %v229_v51 = vld [vmem:[#allocation2 + $0x580] sm:$0xff] }
  0x59   :  { %1013 = vmatpush1.bf16.msra.mxu1 %v1012_v35  ;;  %v559_v35 = vld [vmem:[%s1526_s3 + $0x40] sm:$0xff]  ;;  %v582_v25 = vld [vmem:[%s1526_s3 + $0xf8] sm:$0xff] }
  0x5a   :  { %1089 = vmatpush1.bf16.msra.mxu0 %v1088_v58  ;;  %1015 = vmatprep.subr.bf16.mxu1 %v1014_v37  ;;  %v214_v58 = vld [vmem:[#allocation2 + $0x508] sm:$0xff]  ;;  %v577_v37 = vld [vmem:[%s1526_s3 + $0xd0] sm:$0xff]  ;;  %v1168_v44 = vpack.c.bf16 %v560_v36, %v559_v35  ;;  %v1178_v26 = vpack.c.bf16 %v582_v25, %v581_v24  ;;  %v249_v36 = vld [vmem:[%s1525_s2] sm:$0x3] }
  0x5b   :  { %1091 = vmatprep.subr.bf16.mxu0 %v1090_v59  ;;  %v46_v59 = vld [vmem:[%s1523_s0] sm:$0xff]  ;;  %v1114_v4 = vpack.c.bf16 %v216_v61, %v214_v58  ;;  %v1170_v46 = vpack.c.bf16 %v578_v38, %v577_v37  ;;  %v240_v61 = vld [vmem:[#allocation2 + $0x5d8] sm:$0xff] }
  0x5c   :  { %v233_v58 = vld [vmem:[#allocation2 + $0x5a0] sm:$0xff] }
  0x5d   :  { %1017 = vmatpush1.bf16.msra.mxu1 %v1016_v47  ;;  %v561_v47 = vld [vmem:[%s1526_s3 + $0x50] sm:$0xff]  ;;  %v849_v25 = vld [vmem:[%s1531_s8] ss:$0 sm:$0xff] }
  0x5e   :  { %1093 = vmatpush1.bf16.msra.mxu0 %v1092_v6  ;;  %1151 = vmatprep.subr.bf16.mxu1 %v1150_v49  ;;  %v215_v6 = vld [vmem:[#allocation2 + $0x510] sm:$0xff]  ;;  %v1172_v53 = vpack.c.bf16 %v562_v48, %v561_v47 }
  0x5f   :  { %1095 = vmatprep.subr.bf16.mxu0 %v1094_v7  ;;  %v218_v7 = vld [vmem:[#allocation2 + $0x528] sm:$0xff]  ;;  %v1116_v15 = vpack.c.bf16 %v215_v6, %v213_v5  ;;  %v241_v6 = vld [vmem:[#allocation2 + $0x5e0] sm:$0xff] }
  0x60   :  { %330 = vmatmul.mubr.f32.vlgmr.msra.gmra.mrb[0].mxu1 %v46_v59  ;;  %v1118_v16 = vpack.c.bf16 %v220_v9, %v218_v7  ;;  %v235_v59 = vld [vmem:[#allocation2 + $0x5b0] sm:$0xff]  ;;  %v248_v9 = vld [vmem:[#allocation2 + $0x618] sm:$0xff] }
  0x61   :  { %1153 = vmatpush3.bf16.msra.mxu1 %v1152_v60  ;;  %v238_v60 = vld [vmem:[#allocation2 + $0x5c8] sm:$0xff]  ;;  %v243_v7 = vld [vmem:[#allocation2 + $0x5f0] sm:$0xff] }
  0x62   :  { %1097 = vmatpush1.bf16.msra.mxu0 %v1096_v18  ;;  %1155 = vmatprep.subr.bf16.mxu1 %v1154_v62  ;;  %v219_v18 = vld [vmem:[#allocation2 + $0x530] sm:$0xff]  ;;  %v1136_v62 = vpack.c.bf16 %v235_v59, %v233_v58  ;;  %v1138_v63 = vpack.c.bf16 %v240_v61, %v238_v60  ;;  %v668_v58 = vld [vmem:[%s1528_s5 + $0x38] sm:$0xff]  ;;  %v669_v60 = vld [vmem:[%s1528_s5 + $0x40] sm:$0xff] }
  0x63   :  { %1099 = vmatprep.subr.bf16.mxu0 %v1098_v19  ;;  %v222_v19 = vld [vmem:[#allocation2 + $0x548] sm:$0xff]  ;;  %v1120_v27 = vpack.c.bf16 %v219_v18, %v217_v17  ;;  %v52_v17 = vld [vmem:[%s1523_s0 + $0x30] sm:$0xff]  ;;  %v579_v18 = vld [vmem:[%s1526_s3 + $0xe0] sm:$0xff] }
  0x64   :  { %v1122_v28 = vpack.c.bf16 %v224_v21, %v222_v19  ;;  %v580_v19 = vld [vmem:[%s1526_s3 + $0xe8] sm:$0xff]  ;;  %v563_v21 = vld [vmem:[%s1526_s3 + $0x60] sm:$0xff] }
  0x65   :  { %1157 = vmatpush3.bf16.msra.mxu1 %v1156_v8  ;;  %v246_v8 = vld [vmem:[#allocation2 + $0x608] sm:$0xff] }
  0x66   :  { %1101 = vmatpush1.bf16.msra.mxu0 %v1100_v30  ;;  %1159 = vmatprep.subr.bf16.mxu1 %v1158_v10  ;;  %v223_v30 = vld [vmem:[#allocation2 + $0x550] sm:$0xff]  ;;  %v1144_v10 = vpack.c.bf16 %v243_v7, %v241_v6  ;;  %v1146_v11 = vpack.c.bf16 %v248_v9, %v246_v8  ;;  %v670_v61 = vld [vmem:[%s1528_s5 + $0x48] sm:$0xff]  ;;  %v676_v6 = vld [vmem:[%s1528_s5 + $0x78] sm:$0xff] }
  0x67   :  { %1103 = vmatprep.subr.bf16.mxu0 %v1102_v31  ;;  %v226_v31 = vld [vmem:[#allocation2 + $0x568] sm:$0xff]  ;;  %v1124_v39 = vpack.c.bf16 %v223_v30, %v221_v29  ;;  %v1254_v30 = vmov 0.0|0.0   ;;  %v847_v9 = vld [vmem:[%s1527_s4] ss:$0 sm:$0xff] }
  0x68   :  { %v1126_v40 = vpack.c.bf16 %v228_v33, %v226_v31  ;;  %v251_v33 = vlaneseq }
  0x69   :  { %1161 = vmatpush3.bf16.msra.mxu1 %v1160_v20  ;;  %v1174_v20 = vpack.c.bf16 %v580_v19, %v579_v18  ;;  %v757_v18 = vld [vmem:[%s1530_s7 + $0x10] sm:$0xff]  ;;  %v758_v19 = vld [vmem:[%s1530_s7 + $0x18] sm:$0xff] }
  0x6a   :  { %1105 = vmatpush1.bf16.msra.mxu0 %v1104_v42  ;;  %1163 = vmatprep.subr.bf16.mxu1 %v1162_v22  ;;  %v227_v42 = vld [vmem:[#allocation2 + $0x570] sm:$0xff]  ;;  %v564_v22 = vld [vmem:[%s1526_s3 + $0x68] sm:$0xff] }
  0x6b   :  { %1107 = vmatprep.subr.bf16.mxu0 %v1106_v43  ;;  %v230_v43 = vld [vmem:[#allocation2 + $0x588] sm:$0xff]  ;;  %v1128_v49 = vpack.c.bf16 %v227_v42, %v225_v41  ;;  %v1176_v23 = vpack.c.bf16 %v564_v22, %v563_v21  ;;  %v848_v21 = vld [vmem:[%s1529_s6] ss:$0 sm:$0xff] }
  0x6c   :  { %v1130_v50 = vpack.c.bf16 %v232_v45, %v230_v43  ;;  %v661_v45 = vld [vmem:[%s1528_s5] sm:$0xff] }
  0x6d   :  { %1165 = vmatpush3.bf16.msra.mxu1 %v1164_v32 }
  0x6e   :  { %1109 = vmatpush1.bf16.msra.mxu0 %v1108_v54  ;;  %1167 = vmatprep.subr.bf16.mxu1 %v1166_v34  ;;  %v234_v54 = vld [vmem:[#allocation2 + $0x5a8] sm:$0xff]  ;;  %v252_v34 = vshrl.u32 %v251_v33, 7 }
  0x6f   :  { %1111 = vmatprep.subr.bf16.mxu0 %v1110_v56  ;;  %v1132_v56 = vpack.c.bf16 %v231_v52, %v229_v51  ;;  %v1134_v57 = vpack.c.bf16 %v236_v55, %v234_v54  ;;  %v663_v51 = vld [vmem:[%s1528_s5 + $0x10] sm:$0xff]  ;;  %v664_v52 = vld [vmem:[%s1528_s5 + $0x18] sm:$0xff]  ;;  %v665_v54 = vld [vmem:[%s1528_s5 + $0x20] sm:$0xff] }
  0x70   :  { %v253_v35 = vsub.s32 0, %v252_v34  ;;  %v257_v37 = vsub.s32 1, %v252_v34  ;;  %v666_v55 = vld [vmem:[%s1528_s5 + $0x28] sm:$0xff] }
  0x71   :  { %1169 = vmatpush3.bf16.msra.mxu1 %v1168_v44 }
  0x72   :  { %1113 = vmatpush1.bf16.msra.mxu0 %v1112_v3  ;;  %1171 = vmatprep.subr.bf16.mxu1 %v1170_v46  ;;  %v244_v3 = vld [vmem:[#allocation2 + $0x5f8] sm:$0xff]  ;;  %v254_v38 = vrot.slane %v249_v36, %v253_v35  ;;  %v662_v46 = vld [vmem:[%s1528_s5 + $0x8] sm:$0xff] }
  0x73   :  { %1115 = vmatprep.subr.bf16.mxu0 %v1114_v4  ;;  %v1140_v4 = vpack.c.bf16 %v239_v1, %v237_v0  ;;  %v1142_v5 = vpack.c.bf16 %v244_v3, %v242_v2  ;;  %v672_v0 = vld [vmem:[%s1528_s5 + $0x58] sm:$0xff]  ;;  %v673_v2 = vld [vmem:[%s1528_s5 + $0x60] sm:$0xff]  ;;  %v674_v3 = vld [vmem:[%s1528_s5 + $0x68] sm:$0xff] }
  0x75   :  { %1173 = vmatpush3.bf16.msra.mxu1 %v1172_v53  ;;  %v1186_v53 = vpack.c.bf16 %v664_v52, %v663_v51 }
  0x76   :  { %1117 = vmatpush1.bf16.msra.mxu0 %v1116_v15  ;;  %v1148_v15 = vpack.c.bf16 %v247_v13, %v245_v12  ;;  %1175 = vmatprep.subr.bf16.mxu1 %v1174_v20  ;;  %v755_v12 = vld [vmem:[%s1530_s7] sm:$0xff]  ;;  %v756_v13 = vld [vmem:[%s1530_s7 + $0x8] sm:$0xff]  ;;  %v1210_v20 = vpack.c.bf16 %v758_v19, %v757_v18 }
  0x77   :  { %1119 = vmatprep.subr.bf16.mxu0 %v1118_v16  ;;  %v1253_v16 = vmov 0.0  }
  0x79   :  { %1177 = vmatpush3.bf16.msra.mxu1 %v1176_v23 }
  0x7a   :  { %1121 = vmatpush1.bf16.msra.mxu0 %v1120_v27  ;;  %v565_v27 = vld [vmem:[%s1526_s3 + $0x70] sm:$0xff]  ;;  %1179 = vmatprep.subr.bf16.mxu1 %v1178_v26 }
  0x7b   :  { %1123 = vmatprep.subr.bf16.mxu0 %v1122_v28  ;;  %v566_v28 = vld [vmem:[%s1526_s3 + $0x78] sm:$0xff] }
  0x7c   :  { %v1180_v29 = vpack.c.bf16 %v566_v28, %v565_v27 }
  0x7e   :  { %1125 = vmatpush1.bf16.msra.mxu0 %v1124_v39  ;;  %1181 = vmatpush3.bf16.msra.mxu1 %v1180_v29  ;;  %v258_v39 = vrot.slane %v249_v36, %v257_v37 }
  0x7f   :  { %1127 = vmatprep.subr.bf16.mxu0 %v1126_v40  ;;  %1182 = vmatprep.subr.bf16.mxu1 %v1254_v30 }
  0x82   :  { %1129 = vmatpush1.bf16.msra.mxu0 %v1128_v49  ;;  %v1183_v49 = vpack.c.bf16 %v662_v46, %v661_v45 }
  0x83   :  { %1131 = vmatprep.subr.bf16.mxu0 %v1130_v50 }
  0x86   :  { %1133 = vmatpush1.bf16.msra.mxu0 %v1132_v56  ;;  %v1189_v56 = vpack.c.bf16 %v666_v55, %v665_v54 }
  0x87   :  { %1135 = vmatprep.subr.bf16.mxu0 %v1134_v57  ;;  %v667_v57 = vld [vmem:[%s1528_s5 + $0x30] sm:$0xff] }
  0x88   :  { %v1192_v59 = vpack.c.bf16 %v668_v58, %v667_v57 }
  0x8a   :  { %1137 = vmatpush1.bf16.msra.mxu0 %v1136_v62  ;;  %v1195_v62 = vpack.c.bf16 %v670_v61, %v669_v60 }
  0x8b   :  { %1139 = vmatprep.subr.bf16.mxu0 %v1138_v63  ;;  %v671_v63 = vld [vmem:[%s1528_s5 + $0x50] sm:$0xff] }
  0x8c   :  { %v1198_v1 = vpack.c.bf16 %v672_v0, %v671_v63 }
  0x8e   :  { %1141 = vmatpush1.bf16.msra.mxu0 %v1140_v4  ;;  %v1201_v4 = vpack.c.bf16 %v674_v3, %v673_v2 }
  0x8f   :  { %1143 = vmatprep.subr.bf16.mxu0 %v1142_v5  ;;  %v675_v5 = vld [vmem:[%s1528_s5 + $0x70] sm:$0xff] }
  0x90   :  { %v1204_v7 = vpack.c.bf16 %v676_v6, %v675_v5 }
  0x92   :  { %1145 = vmatpush1.bf16.msra.mxu0 %v1144_v10 }
  0x93   :  { %1147 = vmatprep.subr.bf16.mxu0 %v1146_v11 }
  0x95   :  { %472 = vmatmul.mubr.f32.vlgmr.msra.gmra.mrb[0].mxu0 %v50_v14 }
  0x96   :  { %1149 = vmatpush1.bf16.msra.mxu0 %v1148_v15  ;;  %542 = vmatprep.mubr.f32.mxu0 %v1253_v16  ;;  %v1207_v15 = vpack.c.bf16 %v756_v13, %v755_v12 }
  0x9d   :  { %846 = vmatmul.mubr.msk.f32.vlgmr.msra.gmra.mrb[0].mxu0 %vm261_vm0, %v52_v17 }
 0x133   :  { %v331_v31 = vpop.f32.mrb[0].mxu1 }
 0x134   :  { %v333_v32 = vpop.f32.mrb[1].mxu1  ;;  %v332_v40 = vadd.f32 %v331_v31, %v254_v38 }
 0x135   :  { %v334_v41 = vadd.f32 %v333_v32, %v258_v39 }
 0x170   :  { %v544_v42 = vpop.f32.mrb[0].mxu0 }
 0x171   :  { %v1213_v43 = vadd.f32 %v544_v42, %v332_v40  ;;  %v546_v44 = vpop.f32.mrb[1].mxu0 }
 0x172   :  { %v1215_v47 = vadd.f32 %v546_v44, %v334_v41 }
 0x173   :  { %v549_v50 = vmax.f32 %v1213_v43, 0.0 }
 0x174   :  { %v550_v48 = vmax.f32 %v1215_v47, 0.0 }
 0x176   :  { %654 = vmatprep.mubr.f32.mxu1 %v550_v48 }
 0x177   :  { %655 = vmatmul.mubr.f32.vlgmr.msra.gmra.mrb[2].mxu1 %v549_v50 }
 0x178   :  { %1184 = vmatpush3.bf16.msra.mxu1 %v1183_v49  ;;  %940 = vmatprep.mubr.msk.f32.mxu1 %vm1255_vm1, %v1253_v16 }
 0x179   :  { %1185 = vmatprep.subr.bf16.mxu1 %v1254_v30 }
 0x17c   :  { %1187 = vmatpush3.bf16.msra.mxu1 %v1186_v53 }
 0x17d   :  { %1188 = vmatprep.subr.bf16.mxu1 %v1254_v30 }
 0x180   :  { %1190 = vmatpush3.bf16.msra.mxu1 %v1189_v56 }
 0x181   :  { %1191 = vmatprep.subr.bf16.mxu1 %v1254_v30 }
 0x184   :  { %1193 = vmatpush3.bf16.msra.mxu1 %v1192_v59 }
 0x185   :  { %1194 = vmatprep.subr.bf16.mxu1 %v1254_v30 }
 0x188   :  { %1196 = vmatpush3.bf16.msra.mxu1 %v1195_v62 }
 0x189   :  { %1197 = vmatprep.subr.bf16.mxu1 %v1254_v30 }
 0x18c   :  { %1199 = vmatpush3.bf16.msra.mxu1 %v1198_v1 }
 0x18d   :  { %1200 = vmatprep.subr.bf16.mxu1 %v1254_v30 }
 0x190   :  { %1202 = vmatpush3.bf16.msra.mxu1 %v1201_v4 }
 0x191   :  { %1203 = vmatprep.subr.bf16.mxu1 %v1254_v30 }
 0x194   :  { %1205 = vmatpush3.bf16.msra.mxu1 %v1204_v7 }
 0x195   :  { %1206 = vmatprep.subr.bf16.mxu1 %v1254_v30 }
 0x24a   :  { %v883_v8 = vpop.f32.mrb[2].mxu1 }
 0x24b   :  { %v884_v10 = vpop.f32.mrb[3].mxu1 }
 0x24c   :  { %v885_v11 = vadd.f32 %v884_v10, %v883_v8 }
 0x24e   :  { %v657_v14 = vadd.f32 %v885_v11, %v847_v9 }
 0x250   :  { %v660_v17 = vmax.f32 %v657_v14, 0.0 }
 0x252   :  { %941 = vmatmul.mubr.f32.vlgmr.msra.gmra.mrb[4].mxu1 %v660_v17 }
 0x253   :  { %1208 = vmatpush3.bf16.msra.mxu1 %v1207_v15  ;;  %951 = vmatprep.mubr.msk.f32.mxu1 %vm1255_vm1, %v1253_v16 }
 0x254   :  { %1209 = vmatprep.subr.bf16.mxu1 %v1254_v30 }
 0x257   :  { %1211 = vmatpush3.bf16.msra.mxu1 %v1210_v20 }
 0x325   :  { %v750_v22 = vpop.f32.mrb[4].mxu1 }
 0x326   :  { %v751_v23 = vadd.f32 %v848_v21, %v750_v22  ;;  %v942_v24 = vpop.f32.mrb[5].mxu1 }
 0x328   :  { %v754_v16 = vmax.f32 %v751_v23, 0.0 }
 0x32a   :  { %952 = vmatmul.mubr.msk.f32.vlgmr.msra.gmra.mrb[6].mxu1 %vm766_vm2, %v754_v16 }
 0x3fd   :  { %v836_v26 = vpop.f32.mrb[6].mxu1 }
 0x3fe   :  { %v837_v27 = vadd.f32 %v849_v25, %v836_v26  ;;  %v953_v28 = vpop.f32.mrb[7].mxu1 }
 0x400   :  { %840 = vst [vmem:[%s1532_s9] sm:$0xff] %v837_v27 }
 0x401   :  { %845 = vsyncpa [#allocation3], 1 }

</bundles_post_ra>
